<compile_context>
chip_gen: v5e
topology: v5e:2x2
jax: 0.10.0
libtpu: 0.0.40
codegen_flags: <defaults>
</compile_context>

<pallas_src>
import functools
import math

import jax
import jax.numpy as jnp
from jax.experimental import pallas as pl
from jax.experimental.pallas import tpu as pltpu

_LOG_10000 = math.log(10000.0)
_HALF_PI = math.pi / 2.0
_VMEM_LIMIT_BYTES = 32 * 1024 * 1024  # safe on v5e/v6e (128 MiB) and v7x (64 MiB)


def make_positional_encoding(d_model: int, max_len: int = 500) -> jnp.ndarray:
    """Pure-JAX copy of the PyTorch buffer `pe`, shape (max_len, 1, d_model)."""
    pe = jnp.zeros((max_len, d_model), dtype=jnp.float32)
    position = jnp.arange(0, max_len, dtype=jnp.float32)[:, None]
    div_term = jnp.exp(
        jnp.arange(0, d_model, 2, dtype=jnp.float32) * (-_LOG_10000 / d_model)
    )
    pe = pe.at[:, 0::2].set(jnp.sin(position * div_term))
    if d_model > 1:
        n_odd = pe[:, 1::2].shape[1]
        pe = pe.at[:, 1::2].set(jnp.cos(position * div_term[:n_odd]))
    return pe[:, None, :]


# ----------------------------------------------------------------------------
# Kernels
# ----------------------------------------------------------------------------
def _pe_generate_kernel(x_ref, o_ref, *, d_model: int, batch: int):
    """out = x + PE, with PE generated on-chip.

    x_ref / o_ref: (tile_s, batch * d_model) VMEM tiles over the 2-D
    (seq, batch*d_model) view of x (lane-dense trailing dims).

    Column-only quantities (inv_freq, +pi/2 phase) live on a single (1, d) row
    (hoisted out of the per-element path); cos is folded into sin via the
    phase, so there is exactly one transcendental per generated PE value.  For
    lane-aligned d_model the (tile_s, d_model) slab is computed once and
    replicated across batch, removing the batch-redundant EUP work entirely.
    Padded rows of a ragged last block compute throwaway PE; their stores are
    masked by Pallas, so results stay correct.
    """
    tile_s, bd = x_ref.shape
    d = d_model
    i = pl.program_id(0)

    c2 = jnp.float32(-2.0 * _LOG_10000 / d)  # inv_freq = exp((col // 2) * c2)
    half_pi = jnp.float32(_HALF_PI)

    # Absolute sequence position of each row in this tile: (tile_s, 1), f32.
    pos = (
        jax.lax.broadcasted_iota(jnp.int32, (tile_s, 1), 0).astype(jnp.float32)
        + (i * tile_s).astype(jnp.float32)
    )

    if batch == 1 or d % 128 == 0:
        # One fused sin per (row, feature); column constants on one (1, d) row.
        col = jax.lax.broadcasted_iota(jnp.int32, (1, d), 1).astype(jnp.float32)
        half = jnp.floor(col * 0.5)            # col // 2
        parity = col - 2.0 * half              # col % 2 (0 -> sin, 1 -> cos)
        inv_freq = jnp.exp(half * c2)          # (1, d)
        phase = parity * half_pi
        pe = jnp.sin(pos * inv_freq + phase)   # (tile_s, d)
        if batch > 1:
            # Lane-aligned replication across batch (d % 128 == 0 here).
            pe = jnp.concatenate([pe] * batch, axis=1)   # (tile_s, batch*d)
    else:
        # Small / unaligned d_model: build the per-column pattern directly over
        # all batch*d_model lanes.  Column constants still live on one (1, bd)
        # row and there is still a single fused sin per element (no per-element
        # exp, no sin+cos+where).
        col = jax.lax.broadcasted_iota(jnp.int32, (1, bd), 1).astype(jnp.float32)
        df = jnp.float32(d)
        feat = col - jnp.floor(col / df) * df  # col % d (exact at these sizes)
        half = jnp.floor(feat * 0.5)
        parity = feat - 2.0 * half
        inv_freq = jnp.exp(half * c2)
        phase = parity * half_pi
        pe = jnp.sin(pos * inv_freq + phase)   # (tile_s, bd)

    o_ref[...] = (x_ref[...].astype(jnp.float32) + pe).astype(o_ref.dtype)


def _pe_stream_kernel(x_ref, pe_ref, o_ref):
    """out = x + pe with a precomputed PE stream: pure VPU broadcast-add.

    x_ref/o_ref: (tile_s, B, D); pe_ref: (tile_s, 1, D) broadcast over batch.
    Review-recommended variant for v5e (weakest EUP); adds only ~1/B extra HBM
    read traffic.
    """
    o_ref[...] = (x_ref[...].astype(jnp.float32) + pe_ref[...]).astype(o_ref.dtype)


# ----------------------------------------------------------------------------
# Tiling helpers
# ----------------------------------------------------------------------------
def _pick_tile_s(seq_len: int, row_bytes: int, target_block_bytes: int,
                 min_grid_steps: int) -> int:
    tile_s = max(1, target_block_bytes // max(row_bytes, 1))
    # Give v7x's two TensorCores several balanced grid steps before growing the
    # block further (only matters when the sequence is long enough).
    per_step = pl.cdiv(seq_len, min_grid_steps)
    if per_step >= 8:
        tile_s = min(tile_s, per_step)
    if tile_s >= seq_len:
        return seq_len
    # Multiple of 8 -> only the ragged last block (if any) needs masked rows.
    return max(8, (tile_s // 8) * 8)


def _sanitize_tile_s(tile_s: int, seq_len: int) -> int:
    tile_s = int(tile_s)
    if tile_s >= seq_len:
        return seq_len
    if tile_s < 8:
        return min(8, seq_len)
    return (tile_s // 8) * 8


# ----------------------------------------------------------------------------
# Wrappers
# ----------------------------------------------------------------------------
def _forward_generate(x, tile_s, target_block_bytes, min_grid_steps, in_place):
    seq_len, batch, d_model = x.shape
    bd = batch * d_model
    itemsize = jnp.dtype(x.dtype).itemsize
    if tile_s is None:
        tile_s = _pick_tile_s(seq_len, bd * itemsize, target_block_bytes, min_grid_steps)
    else:
        tile_s = _sanitize_tile_s(tile_s, seq_len)

    x2 = x.reshape(seq_len, bd)  # lane-dense 2-D view (metadata-only reshape)
    grid = (pl.cdiv(seq_len, tile_s),)
    kernel = functools.partial(_pe_generate_kernel, d_model=d_model, batch=batch)

    out2 = pl.pallas_call(
        kernel,
        out_shape=jax.ShapeDtypeStruct((seq_len, bd), x.dtype),
        grid_spec=pltpu.PrefetchScalarGridSpec(
            num_scalar_prefetch=0,
            grid=grid,
            in_specs=[pl.BlockSpec((tile_s, bd), lambda i: (i, 0))],
            out_specs=pl.BlockSpec((tile_s, bd), lambda i: (i, 0)),
        ),
        compiler_params=pltpu.CompilerParams(
            dimension_semantics=("parallel",),          # shardable across v7x's 2 TCs
            vmem_limit_bytes=_VMEM_LIMIT_BYTES,
        ),
        input_output_aliases=({0: 0} if in_place else {}),
    )(x2)
    return out2.reshape(seq_len, batch, d_model)


def _forward_stream(x, tile_s, target_block_bytes, min_grid_steps, in_place):
    seq_len, batch, d_model = x.shape
    itemsize = jnp.dtype(x.dtype).itemsize
    row_bytes = batch * d_model * itemsize + d_model * 4  # x row + pe row
    if tile_s is None:
        tile_s = _pick_tile_s(seq_len, row_bytes, target_block_bytes, min_grid_steps)
    else:
        tile_s = _sanitize_tile_s(tile_s, seq_len)

    pe = make_positional_encoding(d_model, max_len=seq_len)  # (S, 1, D) f32
    grid = (pl.cdiv(seq_len, tile_s),)

    return pl.pallas_call(
        _pe_stream_kernel,
        out_shape=jax.ShapeDtypeStruct((seq_len, batch, d_model), x.dtype),
        grid_spec=pltpu.PrefetchScalarGridSpec(
            num_scalar_prefetch=0,
            grid=grid,
            in_specs=[
                pl.BlockSpec((tile_s, batch, d_model), lambda i: (i, 0, 0)),
                pl.BlockSpec((tile_s, 1, d_model), lambda i: (i, 0, 0)),
            ],
            out_specs=pl.BlockSpec((tile_s, batch, d_model), lambda i: (i, 0, 0)),
        ),
        compiler_params=pltpu.CompilerParams(
            dimension_semantics=("parallel",),
            vmem_limit_bytes=_VMEM_LIMIT_BYTES,
        ),
        input_output_aliases=({0: 0} if in_place else {}),
    )(x, pe)


def positional_encoding_forward(
    x: jnp.ndarray,
    *,
    pe_mode: str = "auto",                 # "generate" | "stream" | "auto"
    tile_s: int | None = None,
    target_block_bytes: int = 4 * 1024 * 1024,
    min_grid_steps: int = 8,
    in_place: bool = False,
) -> jnp.ndarray:
    """x: (seq_len, batch, d_model) -> x + pe[:seq_len]  (PyTorch PositionalEncoding).

    pe_mode:
      "generate": PE synthesized on-chip (no extra HBM stream); one fused sin
                  per PE value, exp/phase hoisted to a single row per tile.
      "stream":   PE precomputed outside and streamed as (tile_s, 1, D); the
                  kernel is a pure VPU broadcast-add (good choice on v5e or
                  when bit-exact parity with a precomputed table is required).
      "auto":     use "generate", fall back to "stream" if the backend cannot
                  lower the in-kernel transcendentals.

    Tiling: ~`target_block_bytes` per block (double-buffered in+out fits the
    explicit 32 MiB VMEM limit on all generations), tile_s a multiple of 8, and
    the block is capped so long sequences keep >= `min_grid_steps` grid steps
    for v7x's two TensorCores.

    in_place=True aliases the output onto x's HBM buffer.  This saves an HBM
    *allocation* only — the add still reads x and writes the result — and it
    requires the caller to actually donate x (jax.jit donate_argnums);
    otherwise the alias silently degrades to a copy.
    """
    if x.ndim != 3:
        raise ValueError(f"expected (seq_len, batch, d_model), got {x.shape}")
    if pe_mode not in ("auto", "generate", "stream"):
        raise ValueError(f"unknown pe_mode: {pe_mode!r}")

    if pe_mode in ("auto", "generate"):
        try:
            return _forward_generate(x, tile_s, target_block_bytes, min_grid_steps, in_place)
        except Exception:
            if pe_mode == "generate":
                raise
            # "auto": fall through to the streamed-PE VPU-add variant.
    return _forward_stream(x, tile_s, target_block_bytes, min_grid_steps, in_place)


if __name__ == "__main__":
    key = jax.random.PRNGKey(0)
    k1, k2 = jax.random.split(key)

    # 1) Toy shape from the source script: (seq_len, batch, d_model) = (8, 2, 32).
    S, B, D = 8, 2, 32
    x = jax.random.normal(k1, (S, B, D), dtype=jnp.float32)
    ref = x + make_positional_encoding(D)[:S]

    out = jax.block_until_ready(positional_encoding_forward(x))
    assert out.shape == (S, B, D)
    assert jnp.allclose(out, ref, atol=2e-4, rtol=1e-4), "generate-mode mismatch (toy shape)"

    # 2) Lane-aligned d_model with a forced multi-step grid and a ragged final
    #    block (exercises the pipelined / batch-replicated / masked-last-block path).
    S2, B2, D2 = 40, 2, 128
    x_big = jax.random.normal(k2, (S2, B2, D2), dtype=jnp.float32)
    ref_big = x_big + make_positional_encoding(D2)[:S2]
    out_big = jax.block_until_ready(positional_encoding_forward(x_big, tile_s=16))
    assert jnp.allclose(out_big, ref_big, atol=2e-4, rtol=1e-4), \
        "generate-mode mismatch (aligned shape)"

    # 3) Streamed-PE variant (pure VPU broadcast-add; review-suggested for v5e).
    out_stream = jax.block_until_ready(positional_encoding_forward(x, pe_mode="stream"))
    assert jnp.allclose(out_stream, ref, atol=1e-5, rtol=1e-5), "stream-mode mismatch"

    print("KERNEL_OK")
</pallas_src>

<mosaic_0001>
module attributes {stable_mosaic.version = 11 : i64} {
  func.func @_pe_generate_kernel(%arg0: i32, %arg1: memref<8x64xf32, #tpu.memory_space<vmem>>, %arg2: memref<8x64xf32, #tpu.memory_space<vmem>>) attributes {dimension_semantics = [#tpu.dimension_semantics<parallel>], iteration_bounds = array<i64: 1>, scalar_prefetch = 0 : i64, scratch_operands = 0 : i64, tpu.core_type = #tpu.core_type<tc>, window_params = [{transform_indices = @transform_0, window_bounds = array<i64: 8, 64>}, {transform_indices = @transform_1, window_bounds = array<i64: 8, 64>}]} {
    %0 = tpu.iota {dimensions = array<i32: 0>} : vector<8x1xi32>
    %1 = arith.sitofp %0 : vector<8x1xi32> to vector<8x1xf32>
    %c8_i32 = arith.constant 8 : i32
    %2 = arith.muli %arg0, %c8_i32 : i32
    %3 = arith.sitofp %2 : i32 to f32
    %4 = vector.broadcast %3 : f32 to vector<8x1xf32>
    %5 = arith.addf %1, %4 : vector<8x1xf32>
    %6 = tpu.iota {dimensions = array<i32: 1>} : vector<1x64xi32>
    %7 = arith.sitofp %6 : vector<1x64xi32> to vector<1x64xf32>
    %cst = arith.constant 3.200000e+01 : f32
    %8 = vector.broadcast %cst : f32 to vector<1x64xf32>
    %9 = arith.divf %7, %8 : vector<1x64xf32>
    %10 = math.floor %9 : vector<1x64xf32>
    %cst_0 = arith.constant 3.200000e+01 : f32
    %11 = vector.broadcast %cst_0 : f32 to vector<1x64xf32>
    %12 = arith.mulf %10, %11 : vector<1x64xf32>
    %13 = arith.subf %7, %12 : vector<1x64xf32>
    %cst_1 = arith.constant 5.000000e-01 : f32
    %14 = vector.broadcast %cst_1 : f32 to vector<1x64xf32>
    %15 = arith.mulf %13, %14 : vector<1x64xf32>
    %16 = math.floor %15 : vector<1x64xf32>
    %cst_2 = arith.constant 2.000000e+00 : f32
    %17 = vector.broadcast %cst_2 : f32 to vector<1x64xf32>
    %18 = arith.mulf %17, %16 : vector<1x64xf32>
    %19 = arith.subf %13, %18 : vector<1x64xf32>
    %cst_3 = arith.constant -0.575646281 : f32
    %20 = vector.broadcast %cst_3 : f32 to vector<1x64xf32>
    %21 = arith.mulf %16, %20 : vector<1x64xf32>
    %22 = math.exp %21 : vector<1x64xf32>
    %cst_4 = arith.constant 1.57079637 : f32
    %23 = vector.broadcast %cst_4 : f32 to vector<1x64xf32>
    %24 = arith.mulf %19, %23 : vector<1x64xf32>
    %25 = vector.broadcast %5 : vector<8x1xf32> to vector<8x64xf32>
    %26 = vector.broadcast %22 : vector<1x64xf32> to vector<8x64xf32>
    %27 = arith.mulf %25, %26 : vector<8x64xf32>
    %28 = vector.broadcast %24 : vector<1x64xf32> to vector<8x64xf32>
    %29 = arith.addf %27, %28 : vector<8x64xf32>
    %30 = math.sin %29 : vector<8x64xf32>
    %c0 = arith.constant 0 : index
    %c0_5 = arith.constant 0 : index
    %31 = vector.load %arg1[%c0, %c0_5] : memref<8x64xf32, #tpu.memory_space<vmem>>, vector<8x64xf32>
    %32 = arith.addf %31, %30 : vector<8x64xf32>
    %c0_6 = arith.constant 0 : index
    %c0_7 = arith.constant 0 : index
    %33 = vector.load %arg2[%c0_6, %c0_7] : memref<8x64xf32, #tpu.memory_space<vmem>>, vector<8x64xf32>
    tpu.vector_store %arg2[%c0_6, %c0_7], %32 {strides = array<i32>} : memref<8x64xf32, #tpu.memory_space<vmem>>, vector<8x64xf32>,
    return
  }
  func.func @transform_0(%arg0: i32) -> (i32, i32) {
    %c0_i32 = arith.constant 0 : i32
    %c0_i32_0 = arith.constant 0 : i32
    return %arg0, %c0_i32 : i32, i32
  }
  func.func @transform_1(%arg0: i32) -> (i32, i32) {
    %c0_i32 = arith.constant 0 : i32
    %c0_i32_0 = arith.constant 0 : i32
    return %arg0, %c0_i32 : i32, i32
  }
}

module attributes {stable_mosaic.version = 11 : i64} {
  func.func @_pe_stream_kernel(%arg0: i32, %arg1: memref<8x2x32xf32, #tpu.memory_space<vmem>>, %arg2: memref<8x1x32xf32, #tpu.memory_space<vmem>>, %arg3: memref<8x2x32xf32, #tpu.memory_space<vmem>>) attributes {dimension_semantics = [#tpu.dimension_semantics<parallel>], iteration_bounds = array<i64: 1>, scalar_prefetch = 0 : i64, scratch_operands = 0 : i64, tpu.core_type = #tpu.core_type<tc>, window_params = [{transform_indices = @transform_0, window_bounds = array<i64: 8, 2, 32>}, {transform_indices = @transform_1, window_bounds = array<i64: 8, 1, 32>}, {transform_indices = @transform_2, window_bounds = array<i64: 8, 2, 32>}]} {
    %c0 = arith.constant 0 : index
    %c0_0 = arith.constant 0 : index
    %c0_1 = arith.constant 0 : index
    %0 = vector.load %arg1[%c0, %c0_0, %c0_1] : memref<8x2x32xf32, #tpu.memory_space<vmem>>, vector<8x2x32xf32>
    %c0_2 = arith.constant 0 : index
    %c0_3 = arith.constant 0 : index
    %c0_4 = arith.constant 0 : index
    %1 = vector.load %arg2[%c0_2, %c0_3, %c0_4] : memref<8x1x32xf32, #tpu.memory_space<vmem>>, vector<8x1x32xf32>
    %2 = vector.broadcast %1 : vector<8x1x32xf32> to vector<8x2x32xf32>
    %3 = arith.addf %0, %2 : vector<8x2x32xf32>
    %c0_5 = arith.constant 0 : index
    %c0_6 = arith.constant 0 : index
    %c0_7 = arith.constant 0 : index
    %4 = vector.load %arg3[%c0_5, %c0_6, %c0_7] : memref<8x2x32xf32, #tpu.memory_space<vmem>>, vector<8x2x32xf32>
    tpu.vector_store %arg3[%c0_5, %c0_6, %c0_7], %3 {strides = array<i32>} : memref<8x2x32xf32, #tpu.memory_space<vmem>>, vector<8x2x32xf32>,
    return
  }
  func.func @transform_0(%arg0: i32) -> (i32, i32, i32) {
    %c0_i32 = arith.constant 0 : i32
    %c0_i32_0 = arith.constant 0 : i32
    %c0_i32_1 = arith.constant 0 : i32
    return %arg0, %c0_i32, %c0_i32_0 : i32, i32, i32
  }
  func.func @transform_1(%arg0: i32) -> (i32, i32, i32) {
    %c0_i32 = arith.constant 0 : i32
    %c0_i32_0 = arith.constant 0 : i32
    %c0_i32_1 = arith.constant 0 : i32
    return %arg0, %c0_i32, %c0_i32_0 : i32, i32, i32
  }
  func.func @transform_2(%arg0: i32) -> (i32, i32, i32) {
    %c0_i32 = arith.constant 0 : i32
    %c0_i32_0 = arith.constant 0 : i32
    %c0_i32_1 = arith.constant 0 : i32
    return %arg0, %c0_i32, %c0_i32_0 : i32, i32, i32
  }
}

</mosaic_0001>

<bundles_post_ra>
// kernel: tpu_custom_call.1
= control target key start
LH: loop header
LB: loop body
LE: loop exit
PB: predicated region body
PF: predicated region fallthrough
CT: control target
= control target key end

     0   :  { %6 = vsyncpa [#allocation3], 0  ;;  %s371_s0 = inlined_call_operand.hbm [shape: f32[8,64], index: 0, kind: input, shape index: {}]   ;;  %s372_s1 = inlined_call_operand.hbm [shape: f32[8,64], index: 1, kind: output, shape index: {}]  }
   0x1   :  { %7 = vsyncpa [#allocation4], 0  ;;  %s13_s8 = sshll.u32 %s371_s0, 4  ;;  %s299_s9 = smov [#allocation2]   ;;  %s14_s8 = int_to_ptr.hbm [resolvable:$true] %s13_s8 }
   0x2   :  { %s15_s10 = sshll.u32 %s299_s9, 4  ;;  %s16_s10 = int_to_ptr.vmem [resolvable:$true] %s15_s10 }
   0x3   :  { %18 = dma.hbm_to_vmem [thread:$0]  %s14_s8, 128, %s16_s10, [#allocation3]  }
   0x4   :  { %295 = dma.done.wait [#allocation3], 128  }
   0x5   :  { %296 = vsyncadd [#allocation3], 4294967168  ;;  %v300_v0 = vmov 32.0   ;;  %v23_v1 = vlaneseq  ;;  %v301_v37 = vmov 683565275   ;;  %s308_s0 = smov [#allocation5]  }
   0x6   :  { %243 = vrcp.f32 %v300_v0  ;;  %v302_v39 = vmov 2475754826   ;;  %v303_v41 = vmov 2131351028   ;;  %v304_v43 = vmov 2102212464  }
   0x7   :  { %v31_v4 = vand.u32 127, %v23_v1  ;;  %v24_v19 = vshrl.u32 %v23_v1, 7  ;;  %v305_v45 = vmov 920167782   ;;  %v306_v51 = vmov 1326507024  }
   0x8   :  { %s218_s11 = sshll.u32 %s308_s0, 4  ;;  %s220_s14 = sshll.u32 %s372_s1, 4  ;;  %s219_s11 = int_to_ptr.vmem [resolvable:$true] %s218_s11  ;;  %s221_s14 = int_to_ptr.hbm [resolvable:$true] %s220_s14 }
   0x9   :  { %v32_v7 = vcvt.s32.f32 %v31_v4  ;;  %v25_v21 = vcvt.s32.f32 %v24_v19 }
   0xc   :  { %v244_v2 = vpop.eup %243 }
   0xd   :  { %v34_v3 = vmul.f32 32.0, %v244_v2  ;;  %vm38_vm0 = vweird.f32 %v244_v2 }
   0xf   :  { %v35_v5 = vsub.f32 1.0, %v34_v3 }
  0x11   :  { %v36_v6 = vmul.f32 %v244_v2, %v35_v5 }
  0x13   :  { %v37_v8 = vadd.f32 %v244_v2, %v36_v6 }
  0x15   :  { %v39_v9 = vsel %vm38_vm0, %v244_v2, %v37_v8 }
  0x16   :  { %v40_v10 = vmul.f32 %v39_v9, %v32_v7 }
  0x18   :  { %v41_v11 = vfloor.f32 %v40_v10 }
  0x1a   :  { %v42_v12 = vmul.f32 32.0, %v41_v11 }
  0x1c   :  { %v43_v13 = vsub.f32 %v32_v7, %v42_v12 }
  0x1e   :  { %v44_v14 = vmul.f32 0.5, %v43_v13 }
  0x20   :  { %v45_v15 = vfloor.f32 %v44_v14 }
  0x22   :  { %v48_v16 = vmul.f32 -0.5756463, %v45_v15  ;;  %v46_v17 = vmul.f32 2.0, %v45_v15 }
  0x24   :  { %v49_v18 = vmul.f32 1.442695, %v48_v16  ;;  %v47_v20 = vsub.f32 %v43_v13, %v46_v17 }
  0x26   :  { %245 = vpow2.f32 %v49_v18  ;;  %v51_v22 = vmul.f32 1.5707964, %v47_v20 }
  0x2c   :  { %v246_v23 = vpop.eup %245 }
  0x2d   :  { %v52_v24 = vmul.f32 %v246_v23, %v25_v21 }
  0x2f   :  { %v322_v25 = vadd.f32 %v52_v24, %v51_v22 }
  0x31   :  { %v57_v26 = vand.u32 2139095040, %v322_v25  ;;  %v54_v28 = vand.u32 2147483647, %v322_v25  ;;  %vm56_vm13 = vcmp.lt.s32.totalorder %v322_v25, 0 }
  0x33   :  { %v58_v27 = vshrl.u32 %v57_v26, 23  ;;  %v61_v31 = vand.u32 8388607, %v54_v28  ;;  %v307_v26 = vmov 0   ;;  %vm55_vm14 = vcmp.le.f32.partialorder %v54_v28, 0.7853982 }
  0x35   :  { %v230_v29 = vadd.s32 4294967169, %v58_v27  ;;  %v62_v34 = vor.u32 8388608, %v61_v31 }
  0x37   :  { %v64_v30 = vadd.s32 1, %v230_v29  ;;  %v331_v53 = vshll.u32 %v62_v34, 8 }
  0x39   :  { %vm65_vm1 = vcmp.gt.s32.totalorder %v64_v30, 0  ;;  %v103_v1 = vand.u32 65535, %v331_v53  ;;  %v104_v2 = vshrl.u32 %v331_v53, 16 }
  0x3a   :  { %v66_v32 = vsel %vm65_vm1, %v64_v30, 0 }
  0x3b   :  { %v68_v33 = vand.u32 31, %v66_v32  ;;  %v328_v35 = vshrl.u32 %v66_v32, 5 }
  0x3d   :  { %v69_v36 = vsub.s32 32, %v68_v33  ;;  %v71_v38 = vshll.u32 %v301_v37, %v68_v33  ;;  %v74_v40 = vshll.u32 %v302_v39, %v68_v33  ;;  %v77_v42 = vshll.u32 %v303_v41, %v68_v33 }
  0x3e   :  { %v80_v44 = vshll.u32 %v304_v43, %v68_v33  ;;  %v83_v46 = vshll.u32 %v305_v45, %v68_v33  ;;  %vm86_vm2 = vcmp.lt.s32.totalorder %v328_v35, 1  ;;  %vm89_vm3 = vcmp.lt.s32.totalorder %v328_v35, 4 }
  0x3f   :  { %v72_v47 = vshrl.u32 %v302_v39, %v69_v36  ;;  %v75_v48 = vshrl.u32 %v303_v41, %v69_v36  ;;  %v78_v49 = vshrl.u32 %v304_v43, %v69_v36  ;;  %v81_v50 = vshrl.u32 %v305_v45, %v69_v36 }
  0x40   :  { %v84_v52 = vshrl.u32 %v306_v51, %v69_v36  ;;  %vm88_vm4 = vcmp.lt.s32.totalorder %v328_v35, 3  ;;  %vm87_vm5 = vcmp.lt.s32.totalorder %v328_v35, 2  ;;  %v70_v9 = vshrl.u32 %v301_v37, %v69_v36 }
  0x41   :  { %v73_v54 = vor.u32 %v72_v47, %v71_v38  ;;  %v76_v55 = vor.u32 %v75_v48, %v74_v40  ;;  %v79_v56 = vor.u32 %v78_v49, %v77_v42  ;;  %v82_v57 = vor.u32 %v81_v50, %v80_v44 }
  0x42   :  { %v85_v58 = vor.u32 %v84_v52, %v83_v46 }
  0x43   :  { %v94_v59 = vsel %vm86_vm2, %v73_v54, %v76_v55  ;;  %v98_v60 = vsel %vm86_vm2, %v76_v55, %v79_v56  ;;  %v95_v61 = vsel %vm89_vm3, %v82_v57, 920167782  ;;  %v90_v22 = vsel %vm86_vm2, %v70_v9, %v73_v54 }
  0x44   :  { %v99_v62 = vsel %vm89_vm3, %v85_v58, 1326507024  ;;  %v96_v63 = vsel %vm88_vm4, %v79_v56, %v95_v61  ;;  %v91_v24 = vsel %vm89_vm3, %v79_v56, 2102212464  ;;  %vm197_vm2 = vweird.f32 %v322_v25 }
  0x45   :  { %v100_v0 = vsel %vm88_vm4, %v82_v57, %v99_v62  ;;  %v97_v3 = vsel %vm87_vm5, %v94_v59, %v96_v63  ;;  %v92_v37 = vsel %vm88_vm4, %v76_v55, %v91_v24  ;;  %vm211_vm3 = vcmask 523264  }
  0x46   :  { %v101_v4 = vsel %vm87_vm5, %v98_v60, %v100_v0  ;;  %v127_v7 = vand.u32 65535, %v97_v3  ;;  %v128_v8 = vshrl.u32 %v97_v3, 16  ;;  %v93_v45 = vsel %vm87_vm5, %v90_v22, %v92_v37  ;;  %v209_v37 = vld [vmem:[#allocation2] sm:$0xff] }
  0x47   :  { %v105_v5 = vand.u32 65535, %v101_v4  ;;  %v106_v6 = vshrl.u32 %v101_v4, 16  ;;  %v147_v49 = vmul.u32 %v331_v53, %v93_v45 }
  0x48   :  { %v129_v13 = vmul.u32 %v127_v7, %v103_v1  ;;  %v130_v14 = vmul.u32 %v128_v8, %v103_v1  ;;  %v131_v15 = vmul.u32 %v127_v7, %v104_v2  ;;  %v132_v19 = vmul.u32 %v128_v8, %v104_v2 }
  0x49   :  { %v107_v10 = vmul.u32 %v105_v5, %v103_v1  ;;  %v108_v11 = vmul.u32 %v106_v6, %v103_v1  ;;  %v109_v12 = vmul.u32 %v105_v5, %v104_v2  ;;  %v110_v16 = vmul.u32 %v106_v6, %v104_v2 }
  0x4a   :  { %v133_v20 = vshll.u32 %v130_v14, 16  ;;  %v135_v21 = vshll.u32 %v131_v15, 16  ;;  %v134_v34 = vshrl.u32 %v130_v14, 16  ;;  %v136_v41 = vshrl.u32 %v131_v15, 16 }
  0x4b   :  { %v111_v17 = vshll.u32 %v108_v11, 16  ;;  %v113_v18 = vshll.u32 %v109_v12, 16  ;;  %v112_v30 = vshrl.u32 %v108_v11, 16  ;;  %v114_v38 = vshrl.u32 %v109_v12, 16 }
  0x4c   :  { %vm137_vm7 = vc.u32 %v129_v13, %v133_v20  ;;  %v139_v29 = vadd.s32 %v133_v20, %v129_v13 }
  0x4d   :  { %vm115_vm6 = vc.u32 %v107_v10, %v111_v17  ;;  %v117_v23 = vadd.s32 %v111_v17, %v107_v10  ;;  %v138_v32 = vsel %vm137_vm7, 1, %v307_v26 }
  0x4e   :  { %v116_v27 = vsel %vm115_vm6, 1, %v307_v26  ;;  %v140_v36 = vadd.s32 %v138_v32, %v132_v19  ;;  %vm141_vm9 = vc.u32 %v139_v29, %v135_v21  ;;  %v143_v44 = vadd.s32 %v139_v29, %v135_v21 }
  0x4f   :  { %v118_v31 = vadd.s32 %v116_v27, %v110_v16  ;;  %vm119_vm8 = vc.u32 %v117_v23, %v113_v18  ;;  %v142_v40 = vsel %vm141_vm9, 1, %v307_v26 }
  0x50   :  { %v120_v33 = vsel %vm119_vm8, 1, %v307_v26  ;;  %v144_v42 = vadd.s32 %v142_v40, %v140_v36 }
  0x51   :  { %v122_v39 = vadd.s32 %v120_v33, %v118_v31 }
  0x52   :  { %v145_v46 = vadd.s32 %v144_v42, %v134_v34 }
  0x53   :  { %v123_v43 = vadd.s32 %v122_v39, %v112_v30 }
  0x54   :  { %v146_v48 = vadd.s32 %v145_v46, %v136_v41 }
  0x55   :  { %v124_v47 = vadd.s32 %v123_v43, %v114_v38 }
  0x56   :  { %v150_v50 = vadd.s32 1, %v146_v48 }
  0x57   :  { %vm149_vm10 = vc.u32 %v124_v47, %v143_v44  ;;  %v148_v35 = vadd.s32 %v143_v44, %v124_v47 }
  0x58   :  { %v151_v51 = vsel %vm149_vm10, %v150_v50, %v146_v48 }
  0x59   :  { %v152_v52 = vadd.s32 %v151_v51, %v147_v49 }
  0x5b   :  { %v153_v54 = vadd.s32 536870912, %v152_v52 }
  0x5d   :  { %v154_v55 = vshrl.u32 %v153_v54, 30 }
  0x5f   :  { %v155_v56 = vshll.u32 %v154_v55, 30  ;;  %v178_v9 = vsub.s32 4, %v154_v55 }
  0x61   :  { %v156_v57 = vsub.s32 %v152_v52, %v155_v56  ;;  %v179_v12 = vsel %vm56_vm13, %v178_v9, %v154_v55 }
  0x62   :  { %v181_v15 = vsel %vm55_vm14, 0, %v179_v12 }
  0x63   :  { %vm157_vm11 = vcmp.lt.s32.totalorder %v156_v57, 0  ;;  %v158_v58 = vsub.s32 0, %v156_v57  ;;  %v198_v20 = vadd.s32 3, %v181_v15 }
  0x65   :  { %v159_v59 = vsel %vm157_vm11, %v158_v58, %v156_v57  ;;  %v199_v26 = vand.u32 3, %v198_v20 }
  0x66   :  { %v160_v60 = vclz %v159_v59 }
  0x67   :  { %vm204_vm15 = vcmp.eq.s32.totalorder %v199_v26, 2  ;;  %vm201_vm0 = vcmp.eq.s32.totalorder %v199_v26, 0  ;;  %vm200_vm1 = vcmp.lt.s32.totalorder %v199_v26, 2 }
  0x68   :  { %v231_v61 = vadd.s32 4294967294, %v160_v60 }
  0x6a   :  { %vm232_vm12 = vcmp.lt.s32.totalorder %v231_v61, 0 }
  0x6b   :  { %v163_v62 = vsel %vm232_vm12, 0, %v231_v61 }
  0x6c   :  { %v164_v63 = vsub.s32 32, %v163_v62  ;;  %v165_v0 = vshll.u32 %v156_v57, %v163_v62  ;;  %v168_v1 = vsub.s32 4294967266, %v163_v62 }
  0x6e   :  { %v166_v53 = vshrl.u32 %v148_v35, %v164_v63  ;;  %v169_v2 = vadd.s32 127, %v168_v1 }
  0x70   :  { %v167_v3 = vor.u32 %v166_v53, %v165_v0  ;;  %v170_v4 = vshll.u32 %v169_v2, 23 }
  0x72   :  { %v171_v5 = vor.u32 4788187, %v170_v4  ;;  %v174_v6 = vcvt.s32.f32 %v167_v3 }
  0x74   :  { %v172_v7 = vand.u32 2147483647, %v171_v5 }
  0x76   :  { %v175_v8 = vmul.f32 %v174_v6, %v172_v7 }
  0x78   :  { %v176_v10 = vxor.u32 2147483648, %v175_v8 }
  0x7a   :  { %v177_v11 = vsel %vm56_vm13, %v176_v10, %v175_v8 }
  0x7b   :  { %v180_v13 = vsel %vm55_vm14, %v322_v25, %v177_v11 }
  0x7c   :  { %v182_v14 = vmul.f32 %v180_v13, %v180_v13 }
  0x7e   :  { %v183_v16 = vmul.f32 -0.001358992, %v182_v14  ;;  %v190_v17 = vmul.f32 -0.00019511016, %v182_v14 }
  0x80   :  { %v184_v18 = vadd.f32 0.041655596, %v183_v16  ;;  %v191_v19 = vadd.f32 0.008332121, %v190_v17 }
  0x82   :  { %v185_v21 = vmul.f32 %v184_v18, %v182_v14  ;;  %v192_v22 = vmul.f32 %v191_v19, %v182_v14 }
  0x84   :  { %v186_v23 = vadd.f32 -0.4999988, %v185_v21  ;;  %v193_v24 = vadd.f32 -0.16666654, %v192_v22 }
  0x86   :  { %v187_v27 = vmul.f32 %v186_v23, %v182_v14  ;;  %v194_v29 = vmul.f32 %v193_v24, %v182_v14 }
  0x88   :  { %v188_v28 = vadd.f32 1.0, %v187_v27  ;;  %v195_v30 = vadd.f32 1.0, %v194_v29 }
  0x8a   :  { %v196_v31 = vmul.f32 %v195_v30, %v180_v13  ;;  %v205_v32 = vxor.u32 2147483648, %v188_v28 }
  0x8c   :  { %v202_v33 = vxor.u32 2147483648, %v196_v31  ;;  %v206_v34 = vsel %vm204_vm15, %v205_v32, %v196_v31 }
  0x8e   :  { %v203_v36 = vsel %vm201_vm0, %v188_v28, %v202_v33 }
  0x8f   :  { %v207_v38 = vsel %vm200_vm1, %v203_v36, %v206_v34 }
  0x90   :  { %v208_v39 = vsel %vm197_vm2, nan, %v207_v38 }
  0x91   :  { %v210_v40 = vadd.f32 %v209_v37, %v208_v39 }
  0x93   :  { %212 = vst.msk [vmem:[#allocation5] sm:$0xff] %vm211_vm3, %v210_v40 }
  0x94   :  { %223 = dma.vmem_to_hbm [thread:$0]  %s219_s11, 128, %s221_s14, [#allocation4]  }
  0x95   :  { %297 = dma.done.wait [#allocation4], 128  }
  0x96   :  { %298 = vsyncadd [#allocation4], 4294967168 }
  0x97   :  { %228 = vsyncpa [#allocation3], 1 }
  0x98   :  { %229 = vsyncpa [#allocation4], 1 }

// kernel: tpu_custom_call.1
= control target key start
LH: loop header
LB: loop body
LE: loop exit
PB: predicated region body
PF: predicated region fallthrough
CT: control target
= control target key end

     0   :  { %7 = vsyncpa [#allocation3], 0  ;;  %s266_s0 = inlined_call_operand.hbm [shape: f32[8,2,32], index: 0, kind: input, shape index: {}]   ;;  %s267_s1 = inlined_call_operand.hbm [shape: f32[8,1,32], index: 1, kind: input, shape index: {}]   ;;  %s268_s2 = inlined_call_operand.hbm [shape: f32[8,2,32], index: 2, kind: output, shape index: {}]  }
   0x1   :  { %8 = vsyncpa [#allocation6], 0 }
   0x2   :  { %9 = vsyncpa [#allocation4], 0  ;;  %s14_s11 = sshll.u32 %s266_s0, 4  ;;  %s214_s12 = smov [#allocation2]   ;;  %s15_s11 = int_to_ptr.hbm [resolvable:$true] %s14_s11 }
   0x3   :  { %s16_s13 = sshll.u32 %s214_s12, 4  ;;  %s27_s16 = sshll.u32 %s267_s1, 4  ;;  %s17_s13 = int_to_ptr.vmem [resolvable:$true] %s16_s13  ;;  %s28_s16 = int_to_ptr.hbm [resolvable:$true] %s27_s16 }
   0x4   :  { %s215_s17 = smov 32   ;;  %s216_s18 = smov 2  }
   0x5   :  { %22 = dma.hbm_to_vmem [thread:$0]  %s15_s11, 256, %s17_s13, [#allocation3], %s215_s17, %s215_s17, %s216_s18  }
   0x6   :  { %s217_s19 = smov [#allocation5]   ;;  %s218_s21 = smov 16  }
   0x7   :  { %s29_s20 = sshll.u32 %s217_s19, 4  ;;  %s219_s0 = smov 1   ;;  %s30_s20 = int_to_ptr.vmem [resolvable:$true] %s29_s20 }
   0x8   :  { %35 = dma.hbm_to_vmem [thread:$0]  %s28_s16, 128, %s30_s20, [#allocation6], %s218_s21, %s218_s21, %s219_s0  }
   0x9   :  { %208 = dma.done.wait [#allocation3], 256  }
   0xa   :  { %209 = vsyncadd [#allocation3], 4294967040 }
   0xb   :  { %210 = dma.done.wait [#allocation6], 128  }
   0xc   :  { %211 = vsyncadd [#allocation6], 4294967168  ;;  %vm92_vm0 = vcmask 254976   ;;  %s220_s22 = smov [#allocation7]   ;;  %s107_s25 = sshll.u32 %s268_s2, 4  ;;  %s108_s25 = int_to_ptr.hbm [resolvable:$true] %s107_s25 }
   0xd   :  { %s245_s1 = sshll.u32 %s220_s22, 4  ;;  %v44_v0 = vld [vmem:[#allocation2] sm:$0x3]  ;;  %v128_v1 = vld [vmem:[#allocation5] ss:$0 sm:$0xff]  ;;  %s106_s1 = int_to_ptr.vmem [resolvable:$true] %s245_s1 }
   0xe   :  { %v45_v2 = vld [vmem:[#allocation2 + $0x2] sm:$0x3]  ;;  %v129_v3 = vld [vmem:[#allocation5 + $0x1] ss:$0 sm:$0xff]  ;;  %v84_v4 = vadd.f32 %v128_v1, %v44_v0  ;;  %v46_v5 = vld [vmem:[#allocation2 + $0x4] sm:$0x3] }
   0xf   :  { %v130_v6 = vld [vmem:[#allocation5 + $0x2] ss:$0 sm:$0xff]  ;;  %v85_v7 = vadd.f32 %v129_v3, %v45_v2  ;;  %v47_v8 = vld [vmem:[#allocation2 + $0x6] sm:$0x3]  ;;  %v131_v9 = vld [vmem:[#allocation5 + $0x3] ss:$0 sm:$0xff] }
  0x10   :  { %93 = vst.msk [vmem:[#allocation7] sm:$0x3] %vm92_vm0, %v84_v4  ;;  %v86_v10 = vadd.f32 %v130_v6, %v46_v5  ;;  %v48_v11 = vld [vmem:[#allocation2 + $0x8] sm:$0x3]  ;;  %v87_v12 = vadd.f32 %v131_v9, %v47_v8  ;;  %v132_v13 = vld [vmem:[#allocation5 + $0x4] ss:$0 sm:$0xff] }
  0x11   :  { %94 = vst.msk [vmem:[#allocation7 + $0x2] sm:$0x3] %vm92_vm0, %v85_v7  ;;  %v49_v14 = vld [vmem:[#allocation2 + $0xa] sm:$0x3]  ;;  %v133_v15 = vld [vmem:[#allocation5 + $0x5] ss:$0 sm:$0xff]  ;;  %v88_v16 = vadd.f32 %v132_v13, %v48_v11 }
  0x12   :  { %95 = vst.msk [vmem:[#allocation7 + $0x4] sm:$0x3] %vm92_vm0, %v86_v10  ;;  %v50_v17 = vld [vmem:[#allocation2 + $0xc] sm:$0x3]  ;;  %v89_v18 = vadd.f32 %v133_v15, %v49_v14  ;;  %v134_v19 = vld [vmem:[#allocation5 + $0x6] ss:$0 sm:$0xff] }
  0x13   :  { %96 = vst.msk [vmem:[#allocation7 + $0x6] sm:$0x3] %vm92_vm0, %v87_v12  ;;  %v51_v20 = vld [vmem:[#allocation2 + $0xe] sm:$0x3]  ;;  %v135_v21 = vld [vmem:[#allocation5 + $0x7] ss:$0 sm:$0xff]  ;;  %v90_v22 = vadd.f32 %v134_v19, %v50_v17 }
  0x14   :  { %97 = vst.msk [vmem:[#allocation7 + $0x8] sm:$0x3] %vm92_vm0, %v88_v16  ;;  %v91_v23 = vadd.f32 %v135_v21, %v51_v20 }
  0x15   :  { %98 = vst.msk [vmem:[#allocation7 + $0xa] sm:$0x3] %vm92_vm0, %v89_v18 }
  0x16   :  { %99 = vst.msk [vmem:[#allocation7 + $0xc] sm:$0x3] %vm92_vm0, %v90_v22 }
  0x17   :  { %100 = vst.msk [vmem:[#allocation7 + $0xe] sm:$0x3] %vm92_vm0, %v91_v23 }
  0x18   :  { %113 = dma.vmem_to_hbm [thread:$0]  %s106_s1, 256, %s108_s25, [#allocation4], %s215_s17, %s215_s17, %s216_s18  }
  0x19   :  { %212 = dma.done.wait [#allocation4], 256  }
  0x1a   :  { %213 = vsyncadd [#allocation4], 4294967040 }
  0x1b   :  { %118 = vsyncpa [#allocation3], 1 }
  0x1c   :  { %119 = vsyncpa [#allocation6], 1 }
  0x1d   :  { %120 = vsyncpa [#allocation4], 1 }

</bundles_post_ra>
